<compile_context>
chip_gen: v7x
topology: tpu7x:2x2x1
jax: 0.10.0
libtpu: 0.0.40
codegen_flags: <defaults>
</compile_context>

<pallas_src>
import functools

import jax
import jax.numpy as jnp
from jax.experimental import pallas as pl
from jax.experimental.pallas import tpu as pltpu

LANES = 128
DEFAULT_TM = 8192  # rows per tile; (8192, 128) f32 = 4 MiB per input block


def _partial_sums_kernel(x_ref, t_ref, out_ref, *, n_valid, tm, mask_last,
                         approx):
    """Per-tile partial sums packed as (1, 4, 128):
       [sum(sigmoid*t), sum(sigmoid), sum(t), sum(bce)] per lane."""
    i = pl.program_id(0)

    def body(masked):
        x = x_ref[...].astype(jnp.float32)
        t = t_ref[...].astype(jnp.float32)

        if masked:
            row = jax.lax.broadcasted_iota(jnp.int32, (tm, LANES), 0) + i * tm
            col = jax.lax.broadcasted_iota(jnp.int32, (tm, LANES), 1)
            valid = (row * LANES + col) < n_valid
            # Neutralize garbage (pad / ragged rows) BEFORE the transcendentals.
            x = jnp.where(valid, x, 0.0)
            t = jnp.where(valid, t, 0.0)

        # Shared transcendental chain: exp feeds both sigmoid and stable BCE.
        e = jnp.exp(-jnp.abs(x))
        d = 1.0 + e
        if approx:
            r = pl.reciprocal(d, approx=True)   # EUP slot, no f32 divide
        else:
            r = 1.0 / d
        s = jnp.where(x >= 0.0, r, e * r)       # numerically stable sigmoid(x)
        # BCEWithLogits (stable): max(x,0) - x*t + log(1 + exp(-|x|)) = log(d)
        bce = jnp.maximum(x, 0.0) - x * t + jnp.log(d)

        if masked:
            # sigmoid(0)=0.5 and bce(0,0)=log(2) at neutralized positions.
            s = jnp.where(valid, s, 0.0)
            bce = jnp.where(valid, bce, 0.0)

        # Reduce only along the sublane axis; cross-lane reduction happens once
        # outside the kernel on a tiny array. Four row-sums packed into the
        # sublanes of one output block -> a single output DMA per step.
        out_ref[...] = jnp.concatenate(
            [jnp.sum(s * t, axis=0, keepdims=True),
             jnp.sum(s, axis=0, keepdims=True),
             jnp.sum(t, axis=0, keepdims=True),
             jnp.sum(bce, axis=0, keepdims=True)],
            axis=0).reshape(1, 4, LANES)

    if mask_last:
        last = pl.num_programs(0) - 1

        @pl.when(i == last)
        def _():
            body(True)

        @pl.when(i != last)
        def _():
            body(False)
    else:
        body(False)


def combined_loss(inputs, targets, *, smooth=1.0, dice_weight=0.5,
                  bce_weight=0.5, tm=DEFAULT_TM, binary_targets=None,
                  approx_reciprocal=True):
    """Pallas implementation of CombinedLoss.forward (Dice + BCEWithLogits)."""
    # Mirror the PyTorch unsqueeze for 3-D targets.
    if targets.ndim == 3 and inputs.ndim == 4:
        targets = targets[:, None, :, :]
    assert inputs.shape == targets.shape, "inputs/targets shape mismatch"

    x = jnp.ravel(inputs)              # native dtype (bf16 ok); cast in-kernel
    t = jnp.ravel(targets)

    # Stream targets as bf16 when they are (known-)hard {0,1} labels: exact and
    # halves the target-side HBM traffic. Auto-enabled for bool/int targets.
    if binary_targets is None:
        binary_targets = (jnp.issubdtype(targets.dtype, jnp.bool_)
                          or jnp.issubdtype(targets.dtype, jnp.integer))
    if binary_targets and t.dtype != jnp.bfloat16:
        t = t.astype(jnp.bfloat16)

    n_valid = x.shape[0]

    # For typical NCHW images H*W is a multiple of 128, so this is a zero-copy
    # reshape (no HBM traffic). Only the rare ragged case pays a small pad.
    n_pad = (-n_valid) % LANES
    if n_pad:
        x = jnp.pad(x, (0, n_pad))
        t = jnp.pad(t, (0, n_pad))
    rows = x.shape[0] // LANES
    x2 = x.reshape(rows, LANES)
    t2 = t.reshape(rows, LANES)

    # Tile height: multiple of 32 (f32/bf16 sublane packing); large to amortize
    # the ~0.35us per-step overhead; capped so the grid keeps >= ~4 steps so
    # v7x's two TensorCores can both stream the "parallel" grid axis.
    tm = max(32, 32 * ((int(tm) + 31) // 32))
    tm = min(tm, max(32, 32 * (pl.cdiv(rows, 4) // 32)))
    tm = min(tm, 32 * pl.cdiv(rows, 32))
    grid = pl.cdiv(rows, tm)

    # Only the last grid step can see indices >= n_valid (tail pad and/or a
    # ragged last row-block); only that step pays the mask cost (via pl.when).
    mask_last = (n_pad != 0) or (rows % tm != 0)

    kernel = functools.partial(
        _partial_sums_kernel, n_valid=int(n_valid), tm=tm,
        mask_last=mask_last, approx=approx_reciprocal)

    in_spec = pl.BlockSpec((tm, LANES), lambda i: (i, 0))
    out_spec = pl.BlockSpec((1, 4, LANES), lambda i: (i, 0, 0))
    out_sds = jax.ShapeDtypeStruct((grid, 4, LANES), jnp.float32)

    # Double-buffered inputs must fit the scoped VMEM limit (v5e default is
    # only 16 MiB); stay well under v7x's 64 MiB physical per-TC VMEM.
    vmem_need = 2 * tm * LANES * (x2.dtype.itemsize + t2.dtype.itemsize)
    vmem_limit = int(min(48 * 1024 * 1024,
                         max(20 * 1024 * 1024, int(1.5 * vmem_need))))

    cost = pl.CostEstimate(
        flops=14 * int(n_valid),
        transcendentals=3 * int(n_valid),
        bytes_accessed=rows * LANES * (x2.dtype.itemsize + t2.dtype.itemsize)
        + grid * 4 * LANES * 4,
    )

    partials = pl.pallas_call(
        kernel,
        out_shape=out_sds,
        grid_spec=pltpu.PrefetchScalarGridSpec(
            num_scalar_prefetch=0,
            grid=(grid,),
            in_specs=[in_spec, in_spec],
            out_specs=out_spec,
        ),
        compiler_params=pltpu.CompilerParams(
            dimension_semantics=("parallel",),
            vmem_limit_bytes=vmem_limit),
        cost_estimate=cost,
    )(x2, t2)

    # Tiny scalar epilogue in plain JAX.
    inter = jnp.sum(partials[:, 0, :])
    ssum = jnp.sum(partials[:, 1, :])
    tsum = jnp.sum(partials[:, 2, :])
    bsum = jnp.sum(partials[:, 3, :])

    dice = (2.0 * inter + smooth) / (ssum + tsum + smooth)
    dice_loss = 1.0 - dice
    bce_loss = bsum / n_valid
    return dice_weight * dice_loss + bce_weight * bce_loss


def _reference_loss(inputs, targets, smooth=1.0, dice_w=0.5, bce_w=0.5):
    if targets.ndim == 3 and inputs.ndim == 4:
        targets = targets[:, None, :, :]
    x = inputs.astype(jnp.float32).reshape(-1)
    t = targets.astype(jnp.float32).reshape(-1)
    s = jax.nn.sigmoid(x)
    inter = jnp.sum(s * t)
    dice = (2.0 * inter + smooth) / (jnp.sum(s) + jnp.sum(t) + smooth)
    dice_loss = 1.0 - dice
    bce = jnp.mean(jnp.maximum(x, 0.0) - x * t + jnp.log1p(jnp.exp(-jnp.abs(x))))
    return dice_w * dice_loss + bce_w * bce


if __name__ == "__main__":
    key = jax.random.PRNGKey(0)
    ks = jax.random.split(key, 10)

    # Test A: small NCHW demo shape, exact-reciprocal mode (tight tolerance).
    # Exercises the masked-last-block path (ragged single block).
    inp_a = jax.random.normal(ks[0], (2, 4, 16, 16), dtype=jnp.float32)
    tgt_a = (jax.random.uniform(ks[1], (2, 4, 16, 16)) > 0.5).astype(jnp.float32)
    loss_a = jax.block_until_ready(
        combined_loss(inp_a, tgt_a, approx_reciprocal=False))
    ref_a = _reference_loss(inp_a, tgt_a)
    assert jnp.allclose(loss_a, ref_a, rtol=1e-5, atol=1e-5), (loss_a, ref_a)

    # Test B: 3-D targets (unsqueeze path), element count multiple of 128
    # -> pad-free unmasked fast path; bf16 target streaming; approx reciprocal.
    inp_b = jax.random.normal(ks[2], (4, 1, 32, 32), dtype=jnp.float32)
    tgt_b = (jax.random.uniform(ks[3], (4, 32, 32)) > 0.5).astype(jnp.float32)
    loss_b = jax.block_until_ready(
        combined_loss(inp_b, tgt_b, binary_targets=True))
    ref_b = _reference_loss(inp_b, tgt_b)
    assert jnp.allclose(loss_b, ref_b, rtol=1e-3, atol=1e-3), (loss_b, ref_b)

    # Test C: bf16 logits + small tile override -> multi-block grid with a
    # ragged last block (mask only on the final pl.when-gated step).
    inp_c = jax.random.normal(ks[4], (2, 4, 96, 96),
                              dtype=jnp.float32).astype(jnp.bfloat16)
    tgt_c = (jax.random.uniform(ks[5], (2, 4, 96, 96)) > 0.5).astype(jnp.float32)
    loss_c = jax.block_until_ready(combined_loss(inp_c, tgt_c, tm=128))
    ref_c = _reference_loss(inp_c, tgt_c)
    assert jnp.allclose(loss_c, ref_c, rtol=1e-3, atol=1e-3), (loss_c, ref_c)

    # Test D: element count NOT a multiple of 128 -> tiny tail pad + mask.
    inp_d = jax.random.normal(ks[6], (2, 3, 10, 10), dtype=jnp.float32)
    tgt_d = (jax.random.uniform(ks[7], (2, 3, 10, 10)) > 0.5).astype(jnp.float32)
    loss_d = jax.block_until_ready(combined_loss(inp_d, tgt_d))
    ref_d = _reference_loss(inp_d, tgt_d)
    assert jnp.allclose(loss_d, ref_d, rtol=1e-3, atol=1e-3), (loss_d, ref_d)

    # Test E: medium shape with default TM -> exercises the grid>=4 tile cap
    # (tm auto-reduced so both v7x TensorCores get work), unmasked path.
    inp_e = jax.random.normal(ks[8], (2, 4, 128, 128), dtype=jnp.float32)
    tgt_e = (jax.random.uniform(ks[9], (2, 4, 128, 128)) > 0.5).astype(jnp.float32)
    loss_e = jax.block_until_ready(combined_loss(inp_e, tgt_e))
    ref_e = _reference_loss(inp_e, tgt_e)
    assert jnp.allclose(loss_e, ref_e, rtol=1e-3, atol=1e-3), (loss_e, ref_e)

    print("KERNEL_OK")
</pallas_src>

<mosaic_0001>
module attributes {stable_mosaic.version = 11 : i64} {
  func.func @_partial_sums_kernel(%arg0: i32, %arg1: memref<32x128xf32, #tpu.memory_space<vmem>>, %arg2: memref<32x128xf32, #tpu.memory_space<vmem>>, %arg3: memref<1x4x128xf32, #tpu.memory_space<vmem>>) attributes {dimension_semantics = [#tpu.dimension_semantics<parallel>], iteration_bounds = array<i64: 1>, scalar_prefetch = 0 : i64, scratch_operands = 0 : i64, tpu.core_type = #tpu.core_type<tc>, window_params = [{transform_indices = @transform_0, window_bounds = array<i64: 32, 128>}, {transform_indices = @transform_1, window_bounds = array<i64: 32, 128>}, {transform_indices = @transform_2, window_bounds = array<i64: 1, 4, 128>}]} {
    %c0_i32 = arith.constant 0 : i32
    %0 = arith.cmpi eq, %arg0, %c0_i32 : i32
    %1 = arith.extui %0 : i1 to i32
    %c0_i32_0 = arith.constant 0 : i32
    %2 = arith.cmpi ne, %1, %c0_i32_0 : i32
    scf.if %2 {
      %c0 = arith.constant 0 : index
      %c0_3 = arith.constant 0 : index
      %6 = vector.load %arg1[%c0, %c0_3] : memref<32x128xf32, #tpu.memory_space<vmem>>, vector<32x128xf32>
      %c0_4 = arith.constant 0 : index
      %c0_5 = arith.constant 0 : index
      %7 = vector.load %arg2[%c0_4, %c0_5] : memref<32x128xf32, #tpu.memory_space<vmem>>, vector<32x128xf32>
      %8 = tpu.iota {dimensions = array<i32: 0>} : vector<32x128xi32>
      %c32_i32 = arith.constant 32 : i32
      %9 = arith.muli %arg0, %c32_i32 : i32
      %10 = vector.broadcast %9 : i32 to vector<32x128xi32>
      %11 = arith.addi %8, %10 : vector<32x128xi32>
      %12 = tpu.iota {dimensions = array<i32: 1>} : vector<32x128xi32>
      %c128_i32 = arith.constant 128 : i32
      %13 = vector.broadcast %c128_i32 : i32 to vector<32x128xi32>
      %14 = arith.muli %11, %13 : vector<32x128xi32>
      %15 = arith.addi %14, %12 : vector<32x128xi32>
      %c2048_i32 = arith.constant 2048 : i32
      %16 = vector.broadcast %c2048_i32 : i32 to vector<32x128xi32>
      %17 = arith.cmpi slt, %15, %16 : vector<32x128xi32>
      %cst = arith.constant 0.000000e+00 : f32
      %18 = vector.broadcast %cst : f32 to vector<32x128xf32>
      %19 = arith.select %17, %6, %18 : vector<32x128xi1>, vector<32x128xf32>
      %cst_6 = arith.constant 0.000000e+00 : f32
      %20 = vector.broadcast %cst_6 : f32 to vector<32x128xf32>
      %21 = arith.select %17, %7, %20 : vector<32x128xi1>, vector<32x128xf32>
      %22 = math.absf %19 : vector<32x128xf32>
      %cst_7 = arith.constant 0.000000e+00 : f32
      %23 = vector.broadcast %cst_7 : f32 to vector<32x128xf32>
      %24 = arith.subf %23, %22 : vector<32x128xf32>
      %25 = math.exp %24 : vector<32x128xf32>
      %cst_8 = arith.constant 1.000000e+00 : f32
      %26 = vector.broadcast %cst_8 : f32 to vector<32x128xf32>
      %27 = arith.addf %26, %25 : vector<32x128xf32>
      %cst_9 = arith.constant 1.000000e+00 : f32
      %28 = vector.broadcast %cst_9 : f32 to vector<32x128xf32>
      %29 = arith.divf %28, %27 : vector<32x128xf32>
      %cst_10 = arith.constant 0.000000e+00 : f32
      %30 = vector.broadcast %cst_10 : f32 to vector<32x128xf32>
      %31 = arith.cmpf oge, %19, %30 : vector<32x128xf32>
      %32 = arith.mulf %25, %29 : vector<32x128xf32>
      %33 = arith.select %31, %29, %32 : vector<32x128xi1>, vector<32x128xf32>
      %cst_11 = arith.constant 0.000000e+00 : f32
      %34 = vector.broadcast %cst_11 : f32 to vector<32x128xf32>
      %35 = arith.maximumf %19, %34 : vector<32x128xf32>
      %36 = arith.mulf %19, %21 : vector<32x128xf32>
      %37 = arith.subf %35, %36 : vector<32x128xf32>
      %38 = math.log %27 : vector<32x128xf32>
      %39 = arith.addf %37, %38 : vector<32x128xf32>
      %cst_12 = arith.constant 0.000000e+00 : f32
      %40 = vector.broadcast %cst_12 : f32 to vector<32x128xf32>
      %41 = arith.select %17, %33, %40 : vector<32x128xi1>, vector<32x128xf32>
      %cst_13 = arith.constant 0.000000e+00 : f32
      %42 = vector.broadcast %cst_13 : f32 to vector<32x128xf32>
      %43 = arith.select %17, %39, %42 : vector<32x128xi1>, vector<32x128xf32>
      %44 = arith.mulf %41, %21 : vector<32x128xf32>
      %cst_14 = arith.constant dense<0.000000e+00> : vector<128xf32>
      %45 = vector.multi_reduction <add>, %44, %cst_14 [0] : vector<32x128xf32> to vector<128xf32>
      %46 = vector.shape_cast %45 : vector<128xf32> to vector<1x128xf32>
      %cst_15 = arith.constant dense<0.000000e+00> : vector<128xf32>
      %47 = vector.multi_reduction <add>, %41, %cst_15 [0] : vector<32x128xf32> to vector<128xf32>
      %48 = vector.shape_cast %47 : vector<128xf32> to vector<1x128xf32>
      %cst_16 = arith.constant dense<0.000000e+00> : vector<128xf32>
      %49 = vector.multi_reduction <add>, %21, %cst_16 [0] : vector<32x128xf32> to vector<128xf32>
      %50 = vector.shape_cast %49 : vector<128xf32> to vector<1x128xf32>
      %cst_17 = arith.constant dense<0.000000e+00> : vector<128xf32>
      %51 = vector.multi_reduction <add>, %43, %cst_17 [0] : vector<32x128xf32> to vector<128xf32>
      %52 = vector.shape_cast %51 : vector<128xf32> to vector<1x128xf32>
      %53 = tpu.concatenate %46, %48, %50, %52 in 0 : vector<1x128xf32>, vector<1x128xf32>, vector<1x128xf32>, vector<1x128xf32> -> vector<4x128xf32>
      %54 = vector.shape_cast %53 : vector<4x128xf32> to vector<1x4x128xf32>
      %c0_18 = arith.constant 0 : index
      %c0_19 = arith.constant 0 : index
      %c0_20 = arith.constant 0 : index
      %55 = vector.load %arg3[%c0_18, %c0_19, %c0_20] : memref<1x4x128xf32, #tpu.memory_space<vmem>>, vector<1x4x128xf32>
      tpu.vector_store %arg3[%c0_18, %c0_19, %c0_20], %54 {strides = array<i32>} : memref<1x4x128xf32, #tpu.memory_space<vmem>>, vector<1x4x128xf32>,
    } else {
    }
    %c0_i32_1 = arith.constant 0 : i32
    %3 = arith.cmpi ne, %arg0, %c0_i32_1 : i32
    %4 = arith.extui %3 : i1 to i32
    %c0_i32_2 = arith.constant 0 : i32
    %5 = arith.cmpi ne, %4, %c0_i32_2 : i32
    scf.if %5 {
      %c0 = arith.constant 0 : index
      %c0_3 = arith.constant 0 : index
      %6 = vector.load %arg1[%c0, %c0_3] : memref<32x128xf32, #tpu.memory_space<vmem>>, vector<32x128xf32>
      %c0_4 = arith.constant 0 : index
      %c0_5 = arith.constant 0 : index
      %7 = vector.load %arg2[%c0_4, %c0_5] : memref<32x128xf32, #tpu.memory_space<vmem>>, vector<32x128xf32>
      %8 = math.absf %6 : vector<32x128xf32>
      %cst = arith.constant 0.000000e+00 : f32
      %9 = vector.broadcast %cst : f32 to vector<32x128xf32>
      %10 = arith.subf %9, %8 : vector<32x128xf32>
      %11 = math.exp %10 : vector<32x128xf32>
      %cst_6 = arith.constant 1.000000e+00 : f32
      %12 = vector.broadcast %cst_6 : f32 to vector<32x128xf32>
      %13 = arith.addf %12, %11 : vector<32x128xf32>
      %cst_7 = arith.constant 1.000000e+00 : f32
      %14 = vector.broadcast %cst_7 : f32 to vector<32x128xf32>
      %15 = arith.divf %14, %13 : vector<32x128xf32>
      %cst_8 = arith.constant 0.000000e+00 : f32
      %16 = vector.broadcast %cst_8 : f32 to vector<32x128xf32>
      %17 = arith.cmpf oge, %6, %16 : vector<32x128xf32>
      %18 = arith.mulf %11, %15 : vector<32x128xf32>
      %19 = arith.select %17, %15, %18 : vector<32x128xi1>, vector<32x128xf32>
      %cst_9 = arith.constant 0.000000e+00 : f32
      %20 = vector.broadcast %cst_9 : f32 to vector<32x128xf32>
      %21 = arith.maximumf %6, %20 : vector<32x128xf32>
      %22 = arith.mulf %6, %7 : vector<32x128xf32>
      %23 = arith.subf %21, %22 : vector<32x128xf32>
      %24 = math.log %13 : vector<32x128xf32>
      %25 = arith.addf %23, %24 : vector<32x128xf32>
      %26 = arith.mulf %19, %7 : vector<32x128xf32>
      %cst_10 = arith.constant dense<0.000000e+00> : vector<128xf32>
      %27 = vector.multi_reduction <add>, %26, %cst_10 [0] : vector<32x128xf32> to vector<128xf32>
      %28 = vector.shape_cast %27 : vector<128xf32> to vector<1x128xf32>
      %cst_11 = arith.constant dense<0.000000e+00> : vector<128xf32>
      %29 = vector.multi_reduction <add>, %19, %cst_11 [0] : vector<32x128xf32> to vector<128xf32>
      %30 = vector.shape_cast %29 : vector<128xf32> to vector<1x128xf32>
      %cst_12 = arith.constant dense<0.000000e+00> : vector<128xf32>
      %31 = vector.multi_reduction <add>, %7, %cst_12 [0] : vector<32x128xf32> to vector<128xf32>
      %32 = vector.shape_cast %31 : vector<128xf32> to vector<1x128xf32>
      %cst_13 = arith.constant dense<0.000000e+00> : vector<128xf32>
      %33 = vector.multi_reduction <add>, %25, %cst_13 [0] : vector<32x128xf32> to vector<128xf32>
      %34 = vector.shape_cast %33 : vector<128xf32> to vector<1x128xf32>
      %35 = tpu.concatenate %28, %30, %32, %34 in 0 : vector<1x128xf32>, vector<1x128xf32>, vector<1x128xf32>, vector<1x128xf32> -> vector<4x128xf32>
      %36 = vector.shape_cast %35 : vector<4x128xf32> to vector<1x4x128xf32>
      %c0_14 = arith.constant 0 : index
      %c0_15 = arith.constant 0 : index
      %c0_16 = arith.constant 0 : index
      %37 = vector.load %arg3[%c0_14, %c0_15, %c0_16] : memref<1x4x128xf32, #tpu.memory_space<vmem>>, vector<1x4x128xf32>
      tpu.vector_store %arg3[%c0_14, %c0_15, %c0_16], %36 {strides = array<i32>} : memref<1x4x128xf32, #tpu.memory_space<vmem>>, vector<1x4x128xf32>,
    } else {
    }
    return
  }
  func.func @transform_0(%arg0: i32) -> (i32, i32) {
    %c0_i32 = arith.constant 0 : i32
    %c0_i32_0 = arith.constant 0 : i32
    return %arg0, %c0_i32 : i32, i32
  }
  func.func @transform_1(%arg0: i32) -> (i32, i32) {
    %c0_i32 = arith.constant 0 : i32
    %c0_i32_0 = arith.constant 0 : i32
    return %arg0, %c0_i32 : i32, i32
  }
  func.func @transform_2(%arg0: i32) -> (i32, i32, i32) {
    %c0_i32 = arith.constant 0 : i32
    %c0_i32_0 = arith.constant 0 : i32
    %c0_i32_1 = arith.constant 0 : i32
    return %arg0, %c0_i32, %c0_i32_0 : i32, i32, i32
  }
}

</mosaic_0001>

<bundles_post_ra>
// kernel: tpu_custom_call.1
= control target key start
LH: loop header
LB: loop body
LE: loop exit
PB: predicated region body
PF: predicated region fallthrough
CT: control target
= control target key end

     0   :  { %7 = vsyncpa [#allocation3], 0  ;;  %s572_s0 = inlined_call_operand.hbm [shape: f32[16,128], index: 0, kind: input, shape index: {}]   ;;  %s573_s1 = inlined_call_operand.hbm [shape: f32[16,128], index: 1, kind: input, shape index: {}]   ;;  %s574_s2 = inlined_call_operand.hbm [shape: f32[1,4,128], index: 2, kind: output, shape index: {}]  }
   0x1   :  { %8 = vsyncpa [#allocation6], 0 }
   0x2   :  { %9 = vsyncpa [#allocation4], 0 }
   0x3   :  { %14 = vsyncadd [#allocation3], 256  ;;  %s444_s9 = smov [#allocation2]   ;;  %s372_s13 = scalar_lea.hbm %s572_s0, 256 }
   0x4   :  { %s15_s10 = sshll.u32 %s444_s9, 4  ;;  %p373_p0 = scmp.ne.s32.totalorder %s572_s0, %s372_s13  ;;  %s16_s10 = int_to_ptr.vmem [resolvable:$true] %s15_s10 }
   0x5   :  { %p376_p1 = scmp.lt.u32.totalorder %s372_s13, %s572_s0 }
   0x7   :  { %p378_p2 = pnand %p376_p1, %p373_p0 }
   0x9   :  { %381 = shalt.err (!%p378_p2)
}
   0xa   :  { %s382_s18 = scalar_lea.vmem %s16_s10, 256  ;;  %s386_s19 = scalar_lea.vmem %s16_s10, 512 }
   0xb   :  { %p383_p3 = scmp.ne.s32.totalorder %s16_s10, %s382_s18  ;;  %p387_p4 = scmp.lt.s32.totalorder %s16_s10, %s16_s10 }
   0xc   :  { %p388_p5 = scmp.lt.s32.totalorder %s386_s19, %s382_s18 }
   0xe   :  { %p389_p6 = por %p388_p5, %p387_p4 }
  0x10   :  { %p390_p7 = pnand %p389_p6, %p383_p3 }
  0x12   :  { %393 = shalt.err (!%p390_p7)
}
  0x13   :  { %s445_s20 = smov 128   ;;  %s446_s21 = smov 8  }
  0x14   :  { %21 = dma.hbm_to_vmem [thread:$0]  %s572_s0, 256, %s16_s10, [#allocation3], %s445_s20, %s445_s20, %s446_s21  }
  0x15   :  { %26 = vsyncadd [#allocation6], 256  ;;  %s447_s24 = smov [#allocation5]   ;;  %s394_s28 = scalar_lea.hbm %s573_s1, 256 }
  0x16   :  { %s27_s25 = sshll.u32 %s447_s24, 4  ;;  %p395_p8 = scmp.ne.s32.totalorder %s573_s1, %s394_s28  ;;  %s28_s25 = int_to_ptr.vmem [resolvable:$true] %s27_s25 }
  0x17   :  { %p398_p9 = scmp.lt.u32.totalorder %s394_s28, %s573_s1 }
  0x19   :  { %p400_p10 = pnand %p398_p9, %p395_p8 }
  0x1b   :  { %403 = shalt.err (!%p400_p10)
}
  0x1c   :  { %s404_s5 = scalar_lea.vmem %s28_s25, 256  ;;  %s408_s0 = scalar_lea.vmem %s28_s25, 512 }
  0x1d   :  { %p405_p11 = scmp.ne.s32.totalorder %s28_s25, %s404_s5  ;;  %p409_p12 = scmp.lt.s32.totalorder %s28_s25, %s28_s25 }
  0x1e   :  { %p410_p13 = scmp.lt.s32.totalorder %s408_s0, %s404_s5 }
  0x20   :  { %p411_p0 = por %p410_p13, %p409_p12 }
  0x22   :  { %p412_p1 = pnand %p411_p0, %p405_p11 }
  0x24   :  { %415 = shalt.err (!%p412_p1)
}
  0x25   :  { %33 = dma.hbm_to_vmem [thread:$0]  %s573_s1, 256, %s28_s25, [#allocation6], %s445_s20, %s445_s20, %s446_s21  }
  0x26   :  { %438 = dma.done.wait [#allocation3], 512  }
  0x27   :  { %439 = vsyncadd [#allocation3], 4294966784 }
  0x28   :  { %440 = dma.done.wait [#allocation6], 512  }
  0x29   :  { %441 = vsyncadd [#allocation6], 4294966784  ;;  %v52_v0 = vlaneseq  ;;  %v44_v10 = vld [vmem:[#allocation2] sm:$0xff]  ;;  %v45_v12 = vld [vmem:[#allocation2 + $0x8] sm:$0xff]  ;;  %vm197_vm8 = vcmask 1040384   ;;  %vm199_vm9 = vcmask 1041408  }
  0x2a   :  { %v46_v13 = vld [vmem:[#allocation2 + $0x10] sm:$0xff]  ;;  %v47_v16 = vld [vmem:[#allocation2 + $0x18] sm:$0xff]  ;;  %v48_v34 = vld [vmem:[#allocation5] sm:$0xff]  ;;  %s448_s1 = smov [#allocation7]   ;;  %vm201_vm10 = vcmask 1042432  }
  0x2b   :  { %v53_v1 = vshrl.u32 %v52_v0, 7  ;;  %v64_v2 = vand.u32 127, %v52_v0  ;;  %v49_v35 = vld [vmem:[#allocation5 + $0x8] sm:$0xff]  ;;  %v50_v40 = vld [vmem:[#allocation5 + $0x10] sm:$0xff]  ;;  %v51_v49 = vld [vmem:[#allocation5 + $0x18] sm:$0xff]  ;;  %s333_s8 = sshll.u32 %s448_s1, 4  ;;  %s334_s8 = int_to_ptr.vmem [resolvable:$true] %s333_s8 }
  0x2c   :  { %s416_s9 = scalar_lea.vmem %s334_s8, 64  ;;  %p421_p3 = scmp.lt.s32.totalorder %s334_s8, %s334_s8 }
  0x2d   :  { %v54_v3 = vadd.s32 8, %v53_v1  ;;  %v55_v4 = vadd.s32 16, %v53_v1  ;;  %v56_v5 = vadd.s32 24, %v53_v1  ;;  %v65_v6 = vmul.u32 128, %v53_v1  ;;  %p417_p2 = scmp.ne.s32.totalorder %s334_s8, %s416_s9  ;;  %p422_p4 = scmp.lt.s32.totalorder %s416_s9, %s416_s9 }
  0x2f   :  { %v66_v7 = vmul.u32 128, %v54_v3  ;;  %v67_v8 = vmul.u32 128, %v55_v4  ;;  %v488_v9 = vadd.s32 %v65_v6, %v64_v2  ;;  %p423_p5 = por %p422_p4, %p421_p3 }
  0x30   :  { %v68_v11 = vmul.u32 128, %v56_v5 }
  0x31   :  { %v490_v14 = vadd.s32 %v66_v7, %v64_v2  ;;  %v492_v15 = vadd.s32 %v67_v8, %v64_v2  ;;  %vm73_vm0 = vcmp.lt.s32.totalorder %v488_v9, 2048  ;;  %p424_p6 = pnand %p423_p5, %p417_p2 }
  0x32   :  { %v495_v17 = vadd.s32 %v68_v11, %v64_v2  ;;  %v499_v18 = vsel %vm73_vm0, %v44_v10, 0.0  ;;  %v81_v37 = vsel %vm73_vm0, %v48_v34, 0.0 }
  0x33   :  { %vm74_vm1 = vcmp.lt.s32.totalorder %v490_v14, 2048  ;;  %vm75_vm2 = vcmp.lt.s32.totalorder %v492_v15, 2048  ;;  %v85_v19 = vand.u32 2147483647, %v499_v18  ;;  %v125_v53 = vmax.f32 %v499_v18, 0.0 }
  0x34   :  { %vm76_vm3 = vcmp.lt.s32.totalorder %v495_v17, 2048  ;;  %v507_v20 = vsel %vm74_vm1, %v45_v12, 0.0  ;;  %v511_v21 = vsel %vm75_vm2, %v46_v13, 0.0  ;;  %v82_v38 = vsel %vm74_vm1, %v49_v35, 0.0 }
  0x35   :  { %v515_v22 = vsel %vm76_vm3, %v47_v16, 0.0  ;;  %v86_v23 = vand.u32 2147483647, %v507_v20  ;;  %v87_v24 = vand.u32 2147483647, %v511_v21  ;;  %v89_v26 = vsub.f32 0.0, %v85_v19 }
  0x36   :  { %v88_v25 = vand.u32 2147483647, %v515_v22  ;;  %v179_v42 = vadd.f32 %v82_v38, %v81_v37  ;;  %v83_v47 = vsel %vm75_vm2, %v50_v40, 0.0  ;;  %v84_v51 = vsel %vm76_vm3, %v51_v49, 0.0 }
  0x37   :  { %v90_v27 = vsub.f32 0.0, %v86_v23  ;;  %v91_v28 = vsub.f32 0.0, %v87_v24  ;;  %v93_v30 = vmul.f32 1.442695, %v89_v26  ;;  %v126_v54 = vmax.f32 %v507_v20, 0.0 }
  0x38   :  { %v92_v29 = vsub.f32 0.0, %v88_v25  ;;  %v180_v50 = vadd.f32 %v179_v42, %v83_v47  ;;  %v129_v55 = vmul.f32 %v81_v37, %v499_v18  ;;  %v130_v56 = vmul.f32 %v82_v38, %v507_v20 }
  0x39   :  { %v95_v31 = vmul.f32 1.442695, %v90_v27  ;;  %348 = vpow2.f32 %v93_v30  ;;  %v97_v32 = vmul.f32 1.442695, %v91_v28  ;;  %v127_v57 = vmax.f32 %v511_v21, 0.0 }
  0x3a   :  { %v99_v33 = vmul.f32 1.442695, %v92_v29  ;;  %v181_v52 = vadd.f32 %v180_v50, %v84_v51  ;;  %v128_v58 = vmax.f32 %v515_v22, 0.0  ;;  %v131_v59 = vmul.f32 %v83_v47, %v511_v21 }
  0x3b   :  { %350 = vpow2.f32 %v95_v31  ;;  %v132_v60 = vmul.f32 %v84_v51, %v515_v22  ;;  %vm113_vm4 = vcmp.ge.f32.partialorder %v499_v18, 0.0  ;;  %vm114_vm5 = vcmp.ge.f32.partialorder %v507_v20, 0.0 }
  0x3c   :  { %352 = vpow2.f32 %v97_v32  ;;  %v182_v62 = vrot.slane %v181_v52, 4  ;;  %vm115_vm6 = vcmp.ge.f32.partialorder %v511_v21, 0.0  ;;  %vm116_vm7 = vcmp.ge.f32.partialorder %v515_v22, 0.0 }
  0x3d   :  { %354 = vpow2.f32 %v99_v33  ;;  %v133_v3 = vsub.f32 %v125_v53, %v129_v55  ;;  %v134_v4 = vsub.f32 %v126_v54, %v130_v56  ;;  %v135_v8 = vsub.f32 %v127_v57, %v131_v59 }
  0x3e   :  { %v136_v10 = vsub.f32 %v128_v58, %v132_v60  ;;  %v183_v18 = vadd.f32 %v182_v62, %v181_v52 }
  0x40   :  { %v184_v49 = vrot.slane %v183_v18, 2 }
  0x42   :  { %v185_v55 = vadd.f32 %v184_v49, %v183_v18 }
  0x43   :  { %v349_v36 = vpop.eup %348 }
  0x44   :  { %v101_v41 = vadd.f32 1.0, %v349_v36  ;;  %v186_v60 = vrot.slane %v185_v55, 1 }
  0x45   :  { %v351_v39 = vpop.eup %350 }
  0x46   :  { %v353_v43 = vpop.eup %352  ;;  %v102_v44 = vadd.f32 1.0, %v351_v39  ;;  %356 = vrcp.f32 %v101_v41 }
  0x47   :  { %v355_v45 = vpop.eup %354  ;;  %v103_v46 = vadd.f32 1.0, %v353_v43 }
  0x48   :  { %v104_v48 = vadd.f32 1.0, %v355_v45  ;;  %358 = vrcp.f32 %v102_v44 }
  0x49   :  { %360 = vrcp.f32 %v103_v46 }
  0x4a   :  { %362 = vrcp.f32 %v104_v48 }
  0x4b   :  { %364 = vlog2.f32 %v101_v41 }
  0x4c   :  { %366 = vlog2.f32 %v102_v44 }
  0x4d   :  { %368 = vlog2.f32 %v103_v46 }
  0x4e   :  { %370 = vlog2.f32 %v104_v48 }
  0x50   :  { %v357_v61 = vpop.eup %356 }
  0x51   :  { %v117_v0 = vmul.f32 %v357_v61, %v349_v36 }
  0x52   :  { %v359_v63 = vpop.eup %358 }
  0x53   :  { %v361_v1 = vpop.eup %360  ;;  %v118_v2 = vmul.f32 %v359_v63, %v351_v39  ;;  %v121_v7 = vsel %vm113_vm4, %v357_v61, %v117_v0 }
  0x54   :  { %v363_v5 = vpop.eup %362  ;;  %v119_v6 = vmul.f32 %v361_v1, %v353_v43  ;;  %v149_v16 = vsel %vm73_vm0, %v121_v7, 0.0 }
  0x55   :  { %v365_v11 = vpop.eup %364  ;;  %v120_v12 = vmul.f32 %v363_v5, %v355_v45  ;;  %v122_v13 = vsel %vm114_vm5, %v359_v63, %v118_v2  ;;  %v157_v25 = vmul.f32 %v149_v16, %v81_v37  ;;  %v187_v2 = vadd.f32 %v186_v60, %v185_v55 }
  0x56   :  { %v367_v19 = vpop.eup %366  ;;  %v123_v20 = vsel %vm115_vm6, %v361_v1, %v119_v6  ;;  %v138_v23 = vmul.f32 0.6931472, %v365_v11  ;;  %v150_v24 = vsel %vm74_vm1, %v122_v13, 0.0 }
  0x57   :  { %v369_v26 = vpop.eup %368  ;;  %v124_v27 = vsel %vm116_vm7, %v363_v5, %v120_v12  ;;  %v140_v28 = vmul.f32 0.6931472, %v367_v19  ;;  %v151_v29 = vsel %vm75_vm2, %v123_v20, 0.0  ;;  %v158_v30 = vmul.f32 %v150_v24, %v82_v38 }
  0x58   :  { %v371_v31 = vpop.eup %370  ;;  %v142_v32 = vmul.f32 0.6931472, %v369_v26  ;;  %v145_v33 = vadd.f32 %v138_v23, %v133_v3  ;;  %v152_v21 = vsel %vm76_vm3, %v124_v27, 0.0  ;;  %v159_v34 = vmul.f32 %v151_v29, %v83_v47 }
  0x59   :  { %v144_v35 = vmul.f32 0.6931472, %v371_v31  ;;  %v146_v36 = vadd.f32 %v140_v28, %v134_v4  ;;  %v160_v39 = vmul.f32 %v152_v21, %v84_v51  ;;  %v161_v37 = vadd.f32 %v158_v30, %v157_v25 }
  0x5a   :  { %v147_v40 = vadd.f32 %v142_v32, %v135_v8  ;;  %v153_v22 = vsel %vm73_vm0, %v145_v33, 0.0  ;;  %v170_v41 = vadd.f32 %v150_v24, %v149_v16 }
  0x5b   :  { %v148_v42 = vadd.f32 %v144_v35, %v136_v10  ;;  %v154_v38 = vsel %vm74_vm1, %v146_v36, 0.0  ;;  %v162_v43 = vadd.f32 %v161_v37, %v159_v34 }
  0x5c   :  { %v155_v44 = vsel %vm75_vm2, %v147_v40, 0.0  ;;  %v171_v45 = vadd.f32 %v170_v41, %v151_v29  ;;  %v188_v46 = vadd.f32 %v154_v38, %v153_v22 }
  0x5d   :  { %v156_v47 = vsel %vm76_vm3, %v148_v42, 0.0  ;;  %v163_v48 = vadd.f32 %v162_v43, %v160_v39 }
  0x5e   :  { %v172_v50 = vadd.f32 %v171_v45, %v152_v21  ;;  %v189_v51 = vadd.f32 %v188_v46, %v155_v44 }
  0x5f   :  { %v164_v9 = vrot.slane %v163_v48, 4 }
  0x60   :  { %v173_v52 = vrot.slane %v172_v50, 4  ;;  %v190_v53 = vadd.f32 %v189_v51, %v156_v47 }
  0x61   :  { %v165_v54 = vadd.f32 %v164_v9, %v163_v48 }
  0x62   :  { %v174_v14 = vadd.f32 %v173_v52, %v172_v50  ;;  %v191_v56 = vrot.slane %v190_v53, 4 }
  0x63   :  { %v166_v57 = vrot.slane %v165_v54, 2 }
  0x64   :  { %v175_v58 = vrot.slane %v174_v14, 2  ;;  %v192_v15 = vadd.f32 %v191_v56, %v190_v53 }
  0x65   :  { %v167_v59 = vadd.f32 %v166_v57, %v165_v54 }
  0x66   :  { %v176_v61 = vadd.f32 %v175_v58, %v174_v14  ;;  %v193_v62 = vrot.slane %v192_v15, 2 }
  0x67   :  { %v168_v17 = vrot.slane %v167_v59, 1 }
  0x68   :  { %v177_v63 = vrot.slane %v176_v61, 1  ;;  %v194_v0 = vadd.f32 %v193_v62, %v192_v15 }
  0x69   :  { %v169_v1 = vadd.f32 %v168_v17, %v167_v59 }
  0x6a   :  { %v178_v3 = vadd.f32 %v177_v63, %v176_v61  ;;  %v195_v4 = vrot.slane %v194_v0, 1 }
  0x6c   :  { %v196_v5 = vadd.f32 %v195_v4, %v194_v0  ;;  %v198_v6 = vsel %vm197_vm8, %v169_v1, %v178_v3 }
  0x6d   :  { %v200_v7 = vsel %vm199_vm9, %v198_v6, %v187_v2 }
  0x6e   :  { %v202_v8 = vsel %vm201_vm10, %v200_v7, %v196_v5 }
  0x6f   :  { %203 = vst [vmem:[#allocation7] sm:$0xf] %v202_v8 }
  0x70   :  { %427 = shalt.err (!%p424_p6)
}
  0x71   :  { %s428_s12 = scalar_lea.hbm %s574_s2, 64 }
  0x72   :  { %p429_p7 = scmp.ne.s32.totalorder %s574_s2, %s428_s12  ;;  %p432_p8 = scmp.lt.u32.totalorder %s428_s12, %s574_s2 }
  0x74   :  { %p434_p9 = pnand %p432_p8, %p429_p7 }
  0x76   :  { %437 = shalt.err (!%p434_p9)
}
  0x77   :  { %336 = dma.vmem_to_hbm [thread:$0]  %s334_s8, 64, %s574_s2, [#allocation4]  }
  0x78   :  { %442 = dma.done.wait [#allocation4], 64  }
  0x79   :  { %443 = vsyncadd [#allocation4], 4294967232 }
  0x7a   :  { %340 = vsyncpa [#allocation3], 1 }
  0x7b   :  { %341 = vsyncpa [#allocation6], 1 }
  0x7c   :  { %342 = vsyncpa [#allocation4], 1 }

</bundles_post_ra>
